<compile_context>
chip_gen: v6e
topology: v6e:2x2x1
jax: 0.10.0
libtpu: 0.0.40
codegen_flags: <defaults>
</compile_context>

<pallas_src>
import math

import jax
import jax.numpy as jnp
from jax.experimental import pallas as pl
from jax.experimental.pallas import tpu as pltpu

_PALLAS_MIN_BYTES = 8 << 20     # below this, a fused XLA add is strictly faster
_TARGET_TILE_BYTES = 4 << 20    # ~4 MiB of x per grid step (HBM-roofline sweet spot)
_MIN_GRID_STEPS = 8             # keep >=8 steps so double-buffering hides DMA


def _round_up(v, m):
    return ((v + m - 1) // m) * m


def _round_down(v, m):
    return (v // m) * m


def make_positional_encoding(d_model: int, max_len: int = 500) -> jnp.ndarray:
    """Deterministic buffer construction, mirroring PositionalEncoding.__init__."""
    d_model_1 = d_model + 1 if d_model % 2 == 1 else d_model
    position = jnp.arange(0, max_len, dtype=jnp.float32)[:, None]            # (max_len, 1)
    div_term = jnp.exp(
        jnp.arange(0, d_model_1, 2, dtype=jnp.float32)
        * (-math.log(10000.0) / d_model_1)
    )                                                                          # (d_model_1//2,)
    pe = jnp.zeros((max_len, d_model_1), dtype=jnp.float32)
    pe = pe.at[:, 0::2].set(jnp.sin(position * div_term))
    pe = pe.at[:, 1::2].set(jnp.cos(position * div_term))
    return pe[:, :d_model]                                                     # (max_len, d_model)


def _pe_add_kernel(x_ref, pe_ref, o_ref):
    # Pure VPU broadcast-add. pe block either has a leading 1 (3-D path,
    # broadcast over the batch-tile) or matches x exactly (reshaped 2-D path).
    o_ref[...] = (x_ref[...] + pe_ref[...]).astype(o_ref.dtype)


def _padded_block_bytes(block_shape, dtype):
    """Conservative VMEM footprint of one block after (sublane, lane) padding."""
    dt = jnp.dtype(dtype)
    sub = 8 * max(1, 4 // dt.itemsize)        # 8 for f32, 16 for bf16, ...
    dims = list(block_shape)
    dims[-1] = _round_up(dims[-1], 128)
    dims[-2] = _round_up(dims[-2], sub)
    nbytes = dt.itemsize
    for d in dims:
        nbytes *= d
    return nbytes


def _vmem_limit(x_block, x_dtype, pe_block, pe_dtype):
    # 2 buffers each for x-in and out, 2 for pe (pe's second buffer is mostly
    # idle because its block index repeats) + generous margin. Raising above
    # v5e's 16 MiB scoped default; well under every chip's physical VMEM.
    need = 2 * (2 * _padded_block_bytes(x_block, x_dtype)
                + _padded_block_bytes(pe_block, pe_dtype))
    return int(min(96 << 20, max(32 << 20, need + (8 << 20))))


def _forward_3d(x, pe_scaled):
    """D on the lane axis, tile over (S, B). Sublane dim = tile_S (multiple of 8)."""
    B, S, D = x.shape
    itemsize = jnp.dtype(x.dtype).itemsize
    row_bytes = D * itemsize                      # one sequence position, one batch elem

    if B * 8 * row_bytes > _TARGET_TILE_BYTES:
        # Huge-batch guard: tile batch as well so the slab stays multi-MiB
        # without the S-tile collapsing below 8 sublanes.
        tile_B = max(1, _TARGET_TILE_BYTES // (8 * row_bytes))
        tile_S = 8 if S >= 8 else S
    else:
        tile_B = B
        cap = _TARGET_TILE_BYTES // (B * row_bytes)
        tile_S = S if cap >= S else max(8, _round_down(cap, 8))
        # Keep >= _MIN_GRID_STEPS S-tiles (when S allows) so the pipeline overlaps.
        if S > 8 * _MIN_GRID_STEPS:
            tile_S = min(tile_S, max(8, _round_up(pl.cdiv(S, _MIN_GRID_STEPS), 8)))

    # Batch innermost: pe block index is constant across consecutive steps,
    # so pe is DMA'd once per S-tile instead of once per (S-tile, B-tile).
    grid = (pl.cdiv(S, tile_S), pl.cdiv(B, tile_B))

    x_block = (tile_B, tile_S, D)
    pe_block = (1, tile_S, D)

    out = pl.pallas_call(
        _pe_add_kernel,
        out_shape=jax.ShapeDtypeStruct((B, S, D), x.dtype),
        grid_spec=pltpu.PrefetchScalarGridSpec(
            num_scalar_prefetch=0,
            grid=grid,
            in_specs=[
                pl.BlockSpec(x_block, lambda s, b: (b, s, 0)),
                pl.BlockSpec(pe_block, lambda s, b: (0, s, 0)),
            ],
            out_specs=pl.BlockSpec(x_block, lambda s, b: (b, s, 0)),
        ),
        compiler_params=pltpu.CompilerParams(
            dimension_semantics=("parallel", "parallel"),
            vmem_limit_bytes=_vmem_limit(x_block, x.dtype, pe_block, pe_scaled.dtype),
        ),
        cost_estimate=pl.CostEstimate(
            flops=B * S * D,
            transcendentals=0,
            bytes_accessed=2 * B * S * D * itemsize
            + S * D * jnp.dtype(pe_scaled.dtype).itemsize,
        ),
    )(x, pe_scaled[None])                          # pe passed as (1, S, D)
    return out


def _forward_reshaped(x, pe_scaled):
    """D not lane-dense but S*D % 1024 == 0: fold 8 sublanes out of the flat axis."""
    B, S, D = x.shape
    n = S * D
    n8 = n // 8                                    # multiple of 128 by dispatcher guarantee
    itemsize = jnp.dtype(x.dtype).itemsize

    x2 = x.reshape(B * 8, n8)                      # row-major: free layout change
    pe2 = pe_scaled.reshape(8, n8)

    cap = max(128, _round_down(_TARGET_TILE_BYTES // (8 * itemsize), 128))
    tile_T = min(n8, cap)
    if n8 > 128 * _MIN_GRID_STEPS:
        tile_T = min(tile_T, max(128, _round_up(pl.cdiv(n8, _MIN_GRID_STEPS), 128)))

    grid = (pl.cdiv(n8, tile_T), B)                # batch innermost: pe block reused

    blk = (8, tile_T)
    out2 = pl.pallas_call(
        _pe_add_kernel,
        out_shape=jax.ShapeDtypeStruct((B * 8, n8), x.dtype),
        grid_spec=pltpu.PrefetchScalarGridSpec(
            num_scalar_prefetch=0,
            grid=grid,
            in_specs=[
                pl.BlockSpec(blk, lambda e, b: (b, e)),
                pl.BlockSpec(blk, lambda e, b: (0, e)),
            ],
            out_specs=pl.BlockSpec(blk, lambda e, b: (b, e)),
        ),
        compiler_params=pltpu.CompilerParams(
            dimension_semantics=("parallel", "parallel"),
            vmem_limit_bytes=_vmem_limit(blk, x.dtype, blk, pe2.dtype),
        ),
        cost_estimate=pl.CostEstimate(
            flops=B * n,
            transcendentals=0,
            bytes_accessed=2 * B * n * itemsize + n * jnp.dtype(pe2.dtype).itemsize,
        ),
    )(x2, pe2)
    return out2.reshape(B, S, D)


def positional_encoding_forward(
    x: jnp.ndarray, pe_const: jnp.ndarray, *, force_pallas: bool = False
) -> jnp.ndarray:
    """x: (B, S, D); pe_const: (max_len, D) f32. Returns x + 0.1 * pe_const[:S]."""
    B, S, D = x.shape
    n = S * D

    # Prescale once in f32 (exact), then match x's storage dtype for bf16
    # inputs (halves pe HBM/VMEM traffic; output stays x.dtype — documented
    # deviation from torch's f32 promotion for low-precision x).
    pe_dtype = jnp.float32 if x.dtype == jnp.float32 else x.dtype
    pe_scaled = (0.1 * pe_const[:S, :].astype(jnp.float32)).astype(pe_dtype)   # (S, D)

    big_enough = (x.size * jnp.dtype(x.dtype).itemsize >= _PALLAS_MIN_BYTES) or force_pallas
    if not big_enough:
        # Small/mid tensors: fused XLA elementwise add already runs at roofline
        # with zero launch / pipeline-warmup cost.
        return (x.astype(pe_scaled.dtype) + pe_scaled[None]).astype(x.dtype)

    if D % 128 == 0:
        return _forward_3d(x, pe_scaled)
    if n % (8 * 128) == 0:
        return _forward_reshaped(x, pe_scaled)
    if force_pallas:
        # Legal (last block dim == full D) but lane-masked stores; test-only path.
        return _forward_3d(x, pe_scaled)
    return (x.astype(pe_scaled.dtype) + pe_scaled[None]).astype(x.dtype)


if __name__ == "__main__":
    max_len = 500

    # 1) Small, lane-dense D: forced through the 3-D Pallas path (single tile).
    B, S, D = 2, 8, 128
    x = jax.random.normal(jax.random.PRNGKey(0), (B, S, D), dtype=jnp.float32)
    pe = make_positional_encoding(D, max_len)
    out = jax.block_until_ready(positional_encoding_forward(x, pe, force_pallas=True))
    ref = x + 0.1 * pe[:S, :][None, :, :]
    assert out.shape == (B, S, D)
    assert jnp.allclose(out, ref, atol=1e-6), "mismatch vs reference (3-D path, 1 tile)"

    # 2) Same path, multi-tile grid (exercises the >=8-step pipelining cap).
    B2, S2, D2 = 2, 128, 128
    x2 = jax.random.normal(jax.random.PRNGKey(1), (B2, S2, D2), dtype=jnp.float32)
    pe2 = make_positional_encoding(D2, max_len)
    out2 = jax.block_until_ready(positional_encoding_forward(x2, pe2, force_pallas=True))
    ref2 = x2 + 0.1 * pe2[:S2, :][None, :, :]
    assert jnp.allclose(out2, ref2, atol=1e-6), "mismatch vs reference (3-D path, tiled)"

    # 3) Non-lane-dense D (32) but S*D % 1024 == 0: reshaped (B*8, n/8) path.
    B3, S3, D3 = 2, 32, 32
    x3 = jax.random.normal(jax.random.PRNGKey(2), (B3, S3, D3), dtype=jnp.float32)
    pe3 = make_positional_encoding(D3, max_len)
    out3 = jax.block_until_ready(positional_encoding_forward(x3, pe3, force_pallas=True))
    ref3 = x3 + 0.1 * pe3[:S3, :][None, :, :]
    assert jnp.allclose(out3, ref3, atol=1e-6), "mismatch vs reference (reshaped path)"

    # 4) Odd d_model, tiny: hits the d_model+1 buffer path; dispatches to the
    #    fused XLA add (by design — too small for the kernel to win).
    B4, S4, D4 = 2, 8, 33
    x4 = jax.random.normal(jax.random.PRNGKey(3), (B4, S4, D4), dtype=jnp.float32)
    pe4 = make_positional_encoding(D4, max_len)
    out4 = jax.block_until_ready(positional_encoding_forward(x4, pe4))
    ref4 = x4 + 0.1 * pe4[:S4, :][None, :, :]
    assert jnp.allclose(out4, ref4, atol=1e-6), "mismatch vs reference (odd d_model)"

    print("KERNEL_OK")
</pallas_src>

<mosaic_0001>
module attributes {stable_mosaic.version = 11 : i64} {
  func.func @_pe_add_kernel(%arg0: i32, %arg1: i32, %arg2: memref<2x8x128xf32, #tpu.memory_space<vmem>>, %arg3: memref<1x8x128xf32, #tpu.memory_space<vmem>>, %arg4: memref<2x8x128xf32, #tpu.memory_space<vmem>>) attributes {dimension_semantics = [#tpu.dimension_semantics<parallel>, #tpu.dimension_semantics<parallel>], iteration_bounds = array<i64: 1, 1>, scalar_prefetch = 0 : i64, scratch_operands = 0 : i64, tpu.core_type = #tpu.core_type<tc>, window_params = [{transform_indices = @transform_0, window_bounds = array<i64: 2, 8, 128>}, {transform_indices = @transform_1, window_bounds = array<i64: 1, 8, 128>}, {transform_indices = @transform_2, window_bounds = array<i64: 2, 8, 128>}]} {
    %c0 = arith.constant 0 : index
    %c0_0 = arith.constant 0 : index
    %c0_1 = arith.constant 0 : index
    %0 = vector.load %arg2[%c0, %c0_0, %c0_1] : memref<2x8x128xf32, #tpu.memory_space<vmem>>, vector<2x8x128xf32>
    %c0_2 = arith.constant 0 : index
    %c0_3 = arith.constant 0 : index
    %c0_4 = arith.constant 0 : index
    %1 = vector.load %arg3[%c0_2, %c0_3, %c0_4] : memref<1x8x128xf32, #tpu.memory_space<vmem>>, vector<1x8x128xf32>
    %2 = vector.broadcast %1 : vector<1x8x128xf32> to vector<2x8x128xf32>
    %3 = arith.addf %0, %2 : vector<2x8x128xf32>
    %c0_5 = arith.constant 0 : index
    %c0_6 = arith.constant 0 : index
    %c0_7 = arith.constant 0 : index
    %4 = vector.load %arg4[%c0_5, %c0_6, %c0_7] : memref<2x8x128xf32, #tpu.memory_space<vmem>>, vector<2x8x128xf32>
    tpu.vector_store %arg4[%c0_5, %c0_6, %c0_7], %3 {strides = array<i32>} : memref<2x8x128xf32, #tpu.memory_space<vmem>>, vector<2x8x128xf32>,
    return
  }
  func.func @transform_0(%arg0: i32, %arg1: i32) -> (i32, i32, i32) {
    %c0_i32 = arith.constant 0 : i32
    %c0_i32_0 = arith.constant 0 : i32
    return %arg1, %arg0, %c0_i32 : i32, i32, i32
  }
  func.func @transform_1(%arg0: i32, %arg1: i32) -> (i32, i32, i32) {
    %c0_i32 = arith.constant 0 : i32
    %c0_i32_0 = arith.constant 0 : i32
    %c0_i32_1 = arith.constant 0 : i32
    return %c0_i32, %arg0, %c0_i32_0 : i32, i32, i32
  }
  func.func @transform_2(%arg0: i32, %arg1: i32) -> (i32, i32, i32) {
    %c0_i32 = arith.constant 0 : i32
    %c0_i32_0 = arith.constant 0 : i32
    return %arg1, %arg0, %c0_i32 : i32, i32, i32
  }
}

</mosaic_0001>

<bundles_post_ra>
// kernel: tpu_custom_call.1
= control target key start
LH: loop header
LB: loop body
LE: loop exit
PB: predicated region body
PF: predicated region fallthrough
CT: control target
= control target key end

     0   :  { %7 = vsyncpa [#allocation3], 0  ;;  %s169_s0 = inlined_call_operand.hbm [shape: f32[2,8,128], index: 0, kind: input, shape index: {}]   ;;  %s170_s1 = inlined_call_operand.hbm [shape: f32[1,8,128], index: 1, kind: input, shape index: {}]   ;;  %s171_s2 = inlined_call_operand.hbm [shape: f32[2,8,128], index: 2, kind: output, shape index: {}]  }
   0x1   :  { %8 = vsyncpa [#allocation6], 0 }
   0x2   :  { %9 = vsyncpa [#allocation4], 0  ;;  %s134_s9 = smov [#allocation2]  }
   0x3   :  { %s15_s10 = sshll.u32 %s134_s9, 4  ;;  %s16_s10 = int_to_ptr.vmem [resolvable:$true] %s15_s10 }
   0x4   :  { %s76_s11 = scalar_lea.vmem %s16_s10, 256  ;;  %p81_p1 = scmp.lt.s32.totalorder %s16_s10, %s16_s10 }
   0x5   :  { %p77_p0 = scmp.ne.s32.totalorder %s16_s10, %s76_s11  ;;  %p82_p2 = scmp.lt.s32.totalorder %s76_s11, %s76_s11 }
   0x7   :  { %p83_p3 = por %p82_p2, %p81_p1 }
   0x9   :  { %p84_p4 = pnand %p83_p3, %p77_p0 }
   0xb   :  { %87 = shalt.err (!%p84_p4)
}
   0xc   :  { %s135_s12 = smov 128   ;;  %s136_s13 = smov 8  }
   0xd   :  { %21 = dma.hbm_to_vmem [thread:$0]  %s169_s0, 256, %s16_s10, [#allocation3], %s135_s12, %s135_s12, %s136_s13  }
   0xe   :  { %s137_s16 = smov [#allocation5]  }
   0xf   :  { %s28_s17 = sshll.u32 %s137_s16, 4  ;;  %s29_s17 = int_to_ptr.vmem [resolvable:$true] %s28_s17 }
  0x10   :  { %s96_s18 = scalar_lea.vmem %s29_s17, 128  ;;  %p101_p6 = scmp.lt.s32.totalorder %s29_s17, %s29_s17 }
  0x11   :  { %p97_p5 = scmp.ne.s32.totalorder %s29_s17, %s96_s18  ;;  %p102_p7 = scmp.lt.s32.totalorder %s96_s18, %s96_s18 }
  0x13   :  { %p103_p8 = por %p102_p7, %p101_p6 }
  0x15   :  { %p104_p9 = pnand %p103_p8, %p97_p5 }
  0x17   :  { %107 = shalt.err (!%p104_p9)
}
  0x18   :  { %31 = dma.hbm_to_vmem [thread:$0]  %s170_s1, 128, %s29_s17, [#allocation6]  }
  0x19   :  { %128 = dma.done.wait [#allocation3], 256  }
  0x1a   :  { %129 = vsyncadd [#allocation3], 4294967040 }
  0x1b   :  { %130 = dma.done.wait [#allocation6], 128  }
  0x1c   :  { %131 = vsyncadd [#allocation6], 4294967168  ;;  %s138_s21 = smov [#allocation7]   ;;  %v38_v0 = vld [vmem:[#allocation2] sm:$0xff]  ;;  %v40_v1 = vld [vmem:[#allocation5] sm:$0xff] }
  0x1d   :  { %s50_s0 = sshll.u32 %s138_s21, 4  ;;  %v39_v2 = vld [vmem:[#allocation2 + $0x8] sm:$0xff]  ;;  %v41_v3 = vadd.f32 %v40_v1, %v38_v0  ;;  %s51_s0 = int_to_ptr.vmem [resolvable:$true] %s50_s0 }
  0x1e   :  { %v42_v4 = vadd.f32 %v40_v1, %v39_v2  ;;  %s108_s22 = scalar_lea.vmem %s51_s0, 256  ;;  %p113_p11 = scmp.lt.s32.totalorder %s51_s0, %s51_s0 }
  0x1f   :  { %43 = vst [vmem:[#allocation7] sm:$0xff] %v41_v3  ;;  %p109_p10 = scmp.ne.s32.totalorder %s51_s0, %s108_s22  ;;  %p114_p12 = scmp.lt.s32.totalorder %s108_s22, %s108_s22 }
  0x20   :  { %44 = vst [vmem:[#allocation7 + $0x8] sm:$0xff] %v42_v4 }
  0x21   :  { %p115_p13 = por %p114_p12, %p113_p11 }
  0x23   :  { %p116_p0 = pnand %p115_p13, %p109_p10 }
  0x25   :  { %119 = shalt.err (!%p116_p0)
}
  0x26   :  { %56 = dma.vmem_to_hbm [thread:$0]  %s51_s0, 256, %s171_s2, [#allocation4], %s135_s12, %s135_s12, %s136_s13  }
  0x27   :  { %132 = dma.done.wait [#allocation4], 256  }
  0x28   :  { %133 = vsyncadd [#allocation4], 4294967040 }
  0x29   :  { %60 = vsyncpa [#allocation3], 1 }
  0x2a   :  { %61 = vsyncpa [#allocation6], 1 }
  0x2b   :  { %62 = vsyncpa [#allocation4], 1 }

</bundles_post_ra>
